<compile_context>
chip_gen: v7x
topology: tpu7x:2x2x1
jax: 0.10.0
libtpu: 0.0.40
codegen_flags: <defaults>
</compile_context>

<pallas_src>
import math

import jax
import jax.numpy as jnp
from jax import lax
from jax.experimental import pallas as pl
from jax.experimental.pallas import tpu as pltpu

LOG_STD_MAX = 2.0
LOG_STD_MIN = -20.0

P = 128                 # lane width: every slab is 128 lanes wide (lane-dense)
CONST_LANE = P - 1      # activation lane carrying a constant 1.0 (bias folding)
HALF_LOG_2PI = 0.5 * math.log(2.0 * math.pi)
LOG2 = math.log(2.0)


def make_actor_kernel(act_limit: float, act_dim: int):
    A = act_dim

    def actor_kernel(xn_ref, p_ref, out_ref):
        # xn_ref : (tile_b, 128) bf16  lanes [0:A)=eps, [A:A+obs)=obs, lane 127 = 1.0
        # p_ref  : (512, 128)    bf16  [W1 | W2 | Wmu | Wls] blocks, biases in row 127
        # out_ref: (tile_b, 128) f32   lanes [0:A)=pi, [A:2A)=mu, [2A:3A)=std, [3A]=logp
        xb = xn_ref[...]
        xf = xb.astype(jnp.float32)

        w1 = p_ref[0 * P:1 * P, :]
        w2 = p_ref[1 * P:2 * P, :]
        wm = p_ref[2 * P:3 * P, :]
        ws = p_ref[3 * P:4 * P, :]

        # MLP trunk: biases ride along via the constant-1.0 lane (row 127 of the
        # weight blocks); W1/W2 column 127 re-emits the 1.0 so ReLU keeps it alive.
        h = jnp.maximum(jnp.dot(xb, w1, preferred_element_type=jnp.float32), 0.0)
        h = jnp.maximum(jnp.dot(h.astype(jnp.bfloat16), w2,
                                preferred_element_type=jnp.float32), 0.0)
        hb = h.astype(jnp.bfloat16)

        # Heads: Wmu emits mu at lanes [0:A) and [A:2A); Wls emits log_std at
        # lanes [0:A) and [2A:3A).  Everything downstream is therefore already
        # lane-aligned and stays full-128-lane (no slices / rolls / relayouts).
        mu_full = jnp.dot(hb, wm, preferred_element_type=jnp.float32)
        ls_full = jnp.clip(jnp.dot(hb, ws, preferred_element_type=jnp.float32),
                           LOG_STD_MIN, LOG_STD_MAX)
        std_full = jnp.exp(ls_full)

        # rsample: pi = mu + std * eps  (eps sits in lanes [0:A) of the input slab).
        pi_full = mu_full + std_full * xf

        # Normal(mu, std).log_prob(pi).sum(-1) with (pi-mu)/std == eps exactly,
        # plus the numerically-stable softplus form of the tanh-squash correction.
        z = -2.0 * pi_full
        softplus_z = jnp.maximum(z, 0.0) + jnp.log1p(jnp.exp(-jnp.abs(z)))
        term = (-0.5 * xf * xf - ls_full - HALF_LOG_2PI
                - 2.0 * (LOG2 - pi_full - softplus_z))
        lane = lax.broadcasted_iota(jnp.int32, (xb.shape[0], P), 1)
        logp = jnp.sum(jnp.where(lane < A, term, 0.0), axis=-1, keepdims=True)

        pi_t = act_limit * jnp.tanh(pi_full)

        # Assemble the whole output slab in vregs -> ONE unmasked full-width store.
        out = jnp.where(lane < A, pi_t,
              jnp.where(lane < 2 * A, mu_full,
              jnp.where(lane < 3 * A, std_full,
              jnp.where(lane == 3 * A, logp, 0.0))))
        out_ref[...] = out

    return actor_kernel


def pack_params(params, obs_dim: int, act_dim: int):
    """Pack (w1,b1,w2,b2,wmu,bmu,wls,bls) into ONE (4*128, 128) bf16 slab.

    All biases are folded into weight row CONST_LANE (driven by the constant-1.0
    activation lane), so the kernel never does a "+ bias" broadcast.
      rows [  0:128): W1   (obs input rows live at [act_dim : act_dim+obs_dim))
      rows [128:256): W2
      rows [256:384): Wmu  -> mu      at lanes [0:A) and [A:2A)
      rows [384:512): Wls  -> log_std at lanes [0:A) and [2A:3A)
    """
    w1, b1, w2, b2, wmu, bmu, wls, bls = [p.astype(jnp.float32) for p in params]
    A = act_dim
    h1, h2 = w1.shape[1], w2.shape[1]
    assert obs_dim + A <= CONST_LANE, "obs_dim + act_dim must fit below the const lane"
    assert max(h1, h2) <= CONST_LANE and 3 * A + 1 <= P

    blk1 = jnp.zeros((P, P), jnp.float32)
    blk1 = blk1.at[A:A + obs_dim, 0:h1].set(w1)          # eps rows [0:A) stay zero
    blk1 = blk1.at[CONST_LANE, 0:h1].set(b1[0])          # folded bias
    blk1 = blk1.at[CONST_LANE, CONST_LANE].set(1.0)      # keep the 1.0 lane alive

    blk2 = jnp.zeros((P, P), jnp.float32)
    blk2 = blk2.at[0:h1, 0:h2].set(w2)
    blk2 = blk2.at[CONST_LANE, 0:h2].set(b2[0])
    blk2 = blk2.at[CONST_LANE, CONST_LANE].set(1.0)

    blkm = jnp.zeros((P, P), jnp.float32)
    blkm = blkm.at[0:h2, 0:A].set(wmu)
    blkm = blkm.at[0:h2, A:2 * A].set(wmu)
    blkm = blkm.at[CONST_LANE, 0:A].set(bmu[0])
    blkm = blkm.at[CONST_LANE, A:2 * A].set(bmu[0])

    blks = jnp.zeros((P, P), jnp.float32)
    blks = blks.at[0:h2, 0:A].set(wls)
    blks = blks.at[0:h2, 2 * A:3 * A].set(wls)
    blks = blks.at[CONST_LANE, 0:A].set(bls[0])
    blks = blks.at[CONST_LANE, 2 * A:3 * A].set(bls[0])

    return jnp.concatenate([blk1, blk2, blkm, blks], axis=0).astype(jnp.bfloat16)


def _round_up(x: int, m: int) -> int:
    return ((x + m - 1) // m) * m


def _choose_tiling(batch: int, target_tile: int = 1024, sublane: int = 16):
    """Pick the batch tile FIRST, then pad the batch up to a multiple of it.

    * target_tile 512-1024 keeps the ~0.35us/grid-step overhead amortized
      (sweep 512/1024/2048 for very large batches; VMEM is not the limit).
    * the tile is capped near half the padded batch so there are >= 2 grid
      blocks whenever possible -> ("parallel",) actually shards across v7x's
      two TensorCores (neutral on single-TC v5e/v6e).
    * sublane=16 keeps bf16 sublane packing happy (and covers f32's 8).
    """
    b_min = max(sublane, _round_up(batch, sublane))
    if b_min >= 2 * sublane:
        tile_cap = _round_up(b_min // 2, sublane)
    else:
        tile_cap = b_min
    tile_b = min(target_tile, tile_cap)
    b_pad = _round_up(b_min, tile_b)
    return b_pad, tile_b


def squashed_gaussian_actor(obs, param_slab, noise, act_limit):
    """Whole SquashedGaussianMLPActor forward (rsample + log_prob) in one kernel."""
    B, obs_dim = obs.shape
    act_dim = noise.shape[1]
    b_pad, tile_b = _choose_tiling(B)

    # One lane-dense bf16 input slab per call: [eps | obs | 0 ... | 1.0].
    xn = jnp.zeros((b_pad, P), jnp.float32)
    xn = xn.at[:B, 0:act_dim].set(noise.astype(jnp.float32))
    xn = xn.at[:B, act_dim:act_dim + obs_dim].set(obs.astype(jnp.float32))
    xn = xn.at[:, CONST_LANE].set(1.0)
    xn = xn.astype(jnp.bfloat16)
    # TODO(synk): for tiny-batch latency, evaluate passing obs/noise as separate
    # unpadded inputs (full-extent last dims) instead of this packed slab
    # (perf-review item 7) and measure against the lane-dense version.

    out = pl.pallas_call(
        make_actor_kernel(float(act_limit), act_dim),
        out_shape=jax.ShapeDtypeStruct((b_pad, P), jnp.float32),
        grid=(b_pad // tile_b,),
        in_specs=[
            pl.BlockSpec((tile_b, P), lambda i: (i, 0)),   # obs+eps slab (bf16)
            # Params: constant block index -> DMA'd once, resident across the grid.
            # (pipeline_mode=pl.Buffered(1) would also drop the idle second buffer;
            #  at 128 KiB it is negligible, so the default buffering is kept.)
            pl.BlockSpec((4 * P, P), lambda i: (0, 0)),
        ],
        out_specs=pl.BlockSpec((tile_b, P), lambda i: (i, 0)),
        compiler_params=pltpu.CompilerParams(
            dimension_semantics=("parallel",)),            # megacore shard on v7x
    )(xn, param_slab)

    pi = out[:B, 0:act_dim]
    mu = out[:B, act_dim:2 * act_dim]
    std = out[:B, 2 * act_dim:3 * act_dim]
    logp = out[:B, 3 * act_dim]
    return pi, logp, mu, std


def init_params(key, obs_dim, hidden_sizes, act_dim):
    """Deterministic synthetic init (Linear weights ~ uniform like PyTorch default)."""
    sizes = [obs_dim] + list(hidden_sizes)
    keys = jax.random.split(key, 2 * (len(sizes) - 1) + 4)
    params = []
    ki = 0
    for j in range(len(sizes) - 1):
        fan_in = sizes[j]
        bound = 1.0 / math.sqrt(fan_in)
        w = jax.random.uniform(keys[ki], (sizes[j], sizes[j + 1]),
                               minval=-bound, maxval=bound, dtype=jnp.float32)
        b = jax.random.uniform(keys[ki + 1], (1, sizes[j + 1]),
                               minval=-bound, maxval=bound, dtype=jnp.float32)
        params += [w, b]
        ki += 2
    fan_in = hidden_sizes[-1]
    bound = 1.0 / math.sqrt(fan_in)
    wmu = jax.random.uniform(keys[ki], (fan_in, act_dim), minval=-bound, maxval=bound,
                             dtype=jnp.float32)
    bmu = jax.random.uniform(keys[ki + 1], (1, act_dim), minval=-bound, maxval=bound,
                             dtype=jnp.float32)
    wls = jax.random.uniform(keys[ki + 2], (fan_in, act_dim), minval=-bound, maxval=bound,
                             dtype=jnp.float32)
    bls = jax.random.uniform(keys[ki + 3], (1, act_dim), minval=-bound, maxval=bound,
                             dtype=jnp.float32)
    params += [wmu, bmu, wls, bls]
    return tuple(params)


def reference_forward(obs, params, noise, act_limit):
    """Plain-JAX f32 reference mirroring the PyTorch forward (rsample, with_logprob)."""
    w1, b1, w2, b2, wmu, bmu, wls, bls = params
    h = jnp.maximum(obs @ w1 + b1, 0.0)
    h = jnp.maximum(h @ w2 + b2, 0.0)
    mu = h @ wmu + bmu
    log_std = jnp.clip(h @ wls + bls, LOG_STD_MIN, LOG_STD_MAX)
    std = jnp.exp(log_std)
    pi = mu + std * noise
    logp = jnp.sum(-0.5 * ((pi - mu) / std) ** 2 - log_std - 0.5 * math.log(2 * math.pi),
                   axis=-1)
    logp -= jnp.sum(2.0 * (math.log(2.0) - pi - jax.nn.softplus(-2.0 * pi)), axis=-1)
    return act_limit * jnp.tanh(pi), logp, mu, std


if __name__ == "__main__":
    B = 8
    OBS_DIM = 16
    HIDDEN = (32, 32)
    ACT_DIM = 4
    ACT_LIMIT = 2.0

    key = jax.random.PRNGKey(0)
    k_obs, k_params, k_noise = jax.random.split(key, 3)

    def bf16_round(x):
        # The kernel's HBM data path is bf16; round the test inputs to
        # bf16-representable values so the f32 reference sees the same numbers.
        return x.astype(jnp.bfloat16).astype(jnp.float32)

    obs = bf16_round(jax.random.normal(k_obs, (B, OBS_DIM), dtype=jnp.float32))
    noise = bf16_round(jax.random.normal(k_noise, (B, ACT_DIM), dtype=jnp.float32))
    params = tuple(bf16_round(p)
                   for p in init_params(k_params, OBS_DIM, HIDDEN, ACT_DIM))

    param_slab = pack_params(params, OBS_DIM, ACT_DIM)   # built once, reused per call

    pi, logp, mu, std = squashed_gaussian_actor(obs, param_slab, noise, ACT_LIMIT)
    jax.block_until_ready((pi, logp, mu, std))

    # Sanity-check against a plain-JAX f32 reference of the PyTorch semantics.
    # Tolerances cover the remaining bf16 rounding of intermediate activations.
    pi_r, logp_r, mu_r, std_r = reference_forward(obs, params, noise, ACT_LIMIT)
    assert jnp.allclose(pi, pi_r, atol=5e-2, rtol=5e-2), "pi mismatch"
    assert jnp.allclose(mu, mu_r, atol=5e-2, rtol=5e-2), "mu mismatch"
    assert jnp.allclose(std, std_r, atol=5e-2, rtol=5e-2), "std mismatch"
    assert jnp.allclose(logp, logp_r, atol=8e-2, rtol=5e-2), "logp mismatch"

    print("KERNEL_OK")
</pallas_src>

<mosaic_0001>
module attributes {stable_mosaic.version = 11 : i64} {
  func.func @actor_kernel(%arg0: i32, %arg1: memref<16x128xbf16, #tpu.memory_space<vmem>>, %arg2: memref<512x128xbf16, #tpu.memory_space<vmem>>, %arg3: memref<16x128xf32, #tpu.memory_space<vmem>>) attributes {dimension_semantics = [#tpu.dimension_semantics<parallel>], iteration_bounds = array<i64: 1>, scalar_prefetch = 0 : i64, scratch_operands = 0 : i64, tpu.core_type = #tpu.core_type<tc>, window_params = [{transform_indices = @transform_0, window_bounds = array<i64: 16, 128>}, {pipeline_mode = #tpu.pipeline_mode<synchronous>, transform_indices = @transform_1, window_bounds = array<i64: 512, 128>}, {transform_indices = @transform_2, window_bounds = array<i64: 16, 128>}]} {
    %c0 = arith.constant 0 : index
    %c0_0 = arith.constant 0 : index
    %0 = vector.load %arg1[%c0, %c0_0] : memref<16x128xbf16, #tpu.memory_space<vmem>>, vector<16x128xbf16>
    %1 = arith.extf %0 : vector<16x128xbf16> to vector<16x128xf32>
    %c0_1 = arith.constant 0 : index
    %c0_2 = arith.constant 0 : index
    %2 = vector.load %arg2[%c0_1, %c0_2] : memref<512x128xbf16, #tpu.memory_space<vmem>>, vector<128x128xbf16>
    %c128 = arith.constant 128 : index
    %c0_3 = arith.constant 0 : index
    %3 = vector.load %arg2[%c128, %c0_3] : memref<512x128xbf16, #tpu.memory_space<vmem>>, vector<128x128xbf16>
    %c256 = arith.constant 256 : index
    %c0_4 = arith.constant 0 : index
    %4 = vector.load %arg2[%c256, %c0_4] : memref<512x128xbf16, #tpu.memory_space<vmem>>, vector<128x128xbf16>
    %c384 = arith.constant 384 : index
    %c0_5 = arith.constant 0 : index
    %5 = vector.load %arg2[%c384, %c0_5] : memref<512x128xbf16, #tpu.memory_space<vmem>>, vector<128x128xbf16>
    %cst = arith.constant dense<0.000000e+00> : vector<16x128xf32>
    %6 = tpu.matmul %0, %2, %cst {dimension_numbers = #tpu.dot_dimension_numbers<[1], [0], [0], [1], [0, 0, 1, 1], [], []>} : vector<16x128xbf16>, vector<128x128xbf16>, vector<16x128xf32> -> vector<16x128xf32>
    %cst_6 = arith.constant 0.000000e+00 : f32
    %7 = vector.broadcast %cst_6 : f32 to vector<16x128xf32>
    %8 = arith.maximumf %6, %7 : vector<16x128xf32>
    %9 = arith.truncf %8 : vector<16x128xf32> to vector<16x128xbf16>
    %cst_7 = arith.constant dense<0.000000e+00> : vector<16x128xf32>
    %10 = tpu.matmul %9, %3, %cst_7 {dimension_numbers = #tpu.dot_dimension_numbers<[1], [0], [0], [1], [0, 0, 1, 1], [], []>} : vector<16x128xbf16>, vector<128x128xbf16>, vector<16x128xf32> -> vector<16x128xf32>
    %cst_8 = arith.constant 0.000000e+00 : f32
    %11 = vector.broadcast %cst_8 : f32 to vector<16x128xf32>
    %12 = arith.maximumf %10, %11 : vector<16x128xf32>
    %13 = arith.truncf %12 : vector<16x128xf32> to vector<16x128xbf16>
    %cst_9 = arith.constant dense<0.000000e+00> : vector<16x128xf32>
    %14 = tpu.matmul %13, %4, %cst_9 {dimension_numbers = #tpu.dot_dimension_numbers<[1], [0], [0], [1], [0, 0, 1, 1], [], []>} : vector<16x128xbf16>, vector<128x128xbf16>, vector<16x128xf32> -> vector<16x128xf32>
    %cst_10 = arith.constant dense<0.000000e+00> : vector<16x128xf32>
    %15 = tpu.matmul %13, %5, %cst_10 {dimension_numbers = #tpu.dot_dimension_numbers<[1], [0], [0], [1], [0, 0, 1, 1], [], []>} : vector<16x128xbf16>, vector<128x128xbf16>, vector<16x128xf32> -> vector<16x128xf32>
    %cst_11 = arith.constant -2.000000e+01 : f32
    %cst_12 = arith.constant 2.000000e+00 : f32
    %16 = vector.broadcast %cst_11 : f32 to vector<16x128xf32>
    %17 = arith.maximumf %16, %15 : vector<16x128xf32>
    %18 = vector.broadcast %cst_12 : f32 to vector<16x128xf32>
    %19 = arith.minimumf %18, %17 : vector<16x128xf32>
    %20 = math.exp %19 : vector<16x128xf32>
    %21 = arith.mulf %20, %1 : vector<16x128xf32>
    %22 = arith.addf %14, %21 : vector<16x128xf32>
    %cst_13 = arith.constant -2.000000e+00 : f32
    %23 = vector.broadcast %cst_13 : f32 to vector<16x128xf32>
    %24 = arith.mulf %23, %22 : vector<16x128xf32>
    %cst_14 = arith.constant 0.000000e+00 : f32
    %25 = vector.broadcast %cst_14 : f32 to vector<16x128xf32>
    %26 = arith.maximumf %24, %25 : vector<16x128xf32>
    %27 = math.absf %24 : vector<16x128xf32>
    %cst_15 = arith.constant 0.000000e+00 : f32
    %28 = vector.broadcast %cst_15 : f32 to vector<16x128xf32>
    %29 = arith.subf %28, %27 : vector<16x128xf32>
    %30 = math.exp %29 : vector<16x128xf32>
    %31 = math.log1p %30 : vector<16x128xf32>
    %32 = arith.addf %26, %31 : vector<16x128xf32>
    %cst_16 = arith.constant -5.000000e-01 : f32
    %33 = vector.broadcast %cst_16 : f32 to vector<16x128xf32>
    %34 = arith.mulf %33, %1 : vector<16x128xf32>
    %35 = arith.mulf %34, %1 : vector<16x128xf32>
    %36 = arith.subf %35, %19 : vector<16x128xf32>
    %cst_17 = arith.constant 0.918938517 : f32
    %37 = vector.broadcast %cst_17 : f32 to vector<16x128xf32>
    %38 = arith.subf %36, %37 : vector<16x128xf32>
    %cst_18 = arith.constant 0.693147182 : f32
    %39 = vector.broadcast %cst_18 : f32 to vector<16x128xf32>
    %40 = arith.subf %39, %22 : vector<16x128xf32>
    %41 = arith.subf %40, %32 : vector<16x128xf32>
    %cst_19 = arith.constant 2.000000e+00 : f32
    %42 = vector.broadcast %cst_19 : f32 to vector<16x128xf32>
    %43 = arith.mulf %42, %41 : vector<16x128xf32>
    %44 = arith.subf %38, %43 : vector<16x128xf32>
    %45 = tpu.iota {dimensions = array<i32: 1>} : vector<16x128xi32>
    %c4_i32 = arith.constant 4 : i32
    %46 = vector.broadcast %c4_i32 : i32 to vector<16x128xi32>
    %47 = arith.cmpi slt, %45, %46 : vector<16x128xi32>
    %cst_20 = arith.constant 0.000000e+00 : f32
    %48 = vector.broadcast %cst_20 : f32 to vector<16x128xf32>
    %49 = arith.select %47, %44, %48 : vector<16x128xi1>, vector<16x128xf32>
    %cst_21 = arith.constant dense<0.000000e+00> : vector<16xf32>
    %50 = vector.multi_reduction <add>, %49, %cst_21 [1] : vector<16x128xf32> to vector<16xf32>
    %51 = vector.shape_cast %50 : vector<16xf32> to vector<16x1xf32>
    %52 = math.tanh %22 : vector<16x128xf32>
    %cst_22 = arith.constant 2.000000e+00 : f32
    %53 = vector.broadcast %cst_22 : f32 to vector<16x128xf32>
    %54 = arith.mulf %53, %52 : vector<16x128xf32>
    %c4_i32_23 = arith.constant 4 : i32
    %55 = vector.broadcast %c4_i32_23 : i32 to vector<16x128xi32>
    %56 = arith.cmpi slt, %45, %55 : vector<16x128xi32>
    %c8_i32 = arith.constant 8 : i32
    %57 = vector.broadcast %c8_i32 : i32 to vector<16x128xi32>
    %58 = arith.cmpi slt, %45, %57 : vector<16x128xi32>
    %c12_i32 = arith.constant 12 : i32
    %59 = vector.broadcast %c12_i32 : i32 to vector<16x128xi32>
    %60 = arith.cmpi slt, %45, %59 : vector<16x128xi32>
    %c12_i32_24 = arith.constant 12 : i32
    %61 = vector.broadcast %c12_i32_24 : i32 to vector<16x128xi32>
    %62 = arith.cmpi eq, %45, %61 : vector<16x128xi32>
    %cst_25 = arith.constant 0.000000e+00 : f32
    %63 = vector.shape_cast %51 : vector<16x1xf32> to vector<16x1xf32>
    %64 = vector.broadcast %63 : vector<16x1xf32> to vector<16x128xf32>
    %65 = vector.broadcast %cst_25 : f32 to vector<16x128xf32>
    %66 = arith.select %62, %64, %65 : vector<16x128xi1>, vector<16x128xf32>
    %67 = arith.select %60, %20, %66 : vector<16x128xi1>, vector<16x128xf32>
    %68 = arith.select %58, %14, %67 : vector<16x128xi1>, vector<16x128xf32>
    %69 = arith.select %56, %54, %68 : vector<16x128xi1>, vector<16x128xf32>
    %c0_26 = arith.constant 0 : index
    %c0_27 = arith.constant 0 : index
    %70 = vector.load %arg3[%c0_26, %c0_27] : memref<16x128xf32, #tpu.memory_space<vmem>>, vector<16x128xf32>
    tpu.vector_store %arg3[%c0_26, %c0_27], %69 {strides = array<i32>} : memref<16x128xf32, #tpu.memory_space<vmem>>, vector<16x128xf32>,
    return
  }
  func.func @transform_0(%arg0: i32) -> (i32, i32) {
    %c0_i32 = arith.constant 0 : i32
    %c0_i32_0 = arith.constant 0 : i32
    return %arg0, %c0_i32 : i32, i32
  }
  func.func @transform_1(%arg0: i32) -> (i32, i32) {
    %c0_i32 = arith.constant 0 : i32
    %c0_i32_0 = arith.constant 0 : i32
    %c0_i32_1 = arith.constant 0 : i32
    return %c0_i32, %c0_i32_0 : i32, i32
  }
  func.func @transform_2(%arg0: i32) -> (i32, i32) {
    %c0_i32 = arith.constant 0 : i32
    %c0_i32_0 = arith.constant 0 : i32
    return %arg0, %c0_i32 : i32, i32
  }
}

</mosaic_0001>

<bundles_post_ra>
// kernel: tpu_custom_call.1
= control target key start
LH: loop header
LB: loop body
LE: loop exit
PB: predicated region body
PF: predicated region fallthrough
CT: control target
= control target key end

     0   :  { %7 = vsyncpa [#allocation3], 0  ;;  %s991_s0 = inlined_call_operand.hbm [shape: bf16[16,128], index: 0, kind: input, shape index: {}]   ;;  %s992_s1 = inlined_call_operand.hbm [shape: bf16[512,128], index: 1, kind: input, shape index: {}]   ;;  %s993_s2 = inlined_call_operand.hbm [shape: f32[16,128], index: 2, kind: output, shape index: {}]  }
   0x1   :  { %8 = vsyncpa [#allocation6], 0 }
   0x2   :  { %9 = vsyncpa [#allocation4], 0  ;;  %s863_s9 = smov [#allocation2]   ;;  %s791_s13 = scalar_lea.hbm %s991_s0, 128 }
   0x3   :  { %s15_s10 = sshll.u32 %s863_s9, 4  ;;  %p792_p0 = scmp.ne.s32.totalorder %s991_s0, %s791_s13  ;;  %s16_s10 = int_to_ptr.vmem [resolvable:$true] %s15_s10 }
   0x4   :  { %p795_p1 = scmp.lt.u32.totalorder %s791_s13, %s991_s0 }
   0x6   :  { %p797_p2 = pnand %p795_p1, %p792_p0 }
   0x8   :  { %800 = shalt.err (!%p797_p2)
}
   0x9   :  { %s801_s18 = scalar_lea.vmem %s16_s10, 128  ;;  %p806_p4 = scmp.lt.s32.totalorder %s16_s10, %s16_s10 }
   0xa   :  { %p802_p3 = scmp.ne.s32.totalorder %s16_s10, %s801_s18  ;;  %p807_p5 = scmp.lt.s32.totalorder %s801_s18, %s801_s18 }
   0xc   :  { %p808_p6 = por %p807_p5, %p806_p4 }
   0xe   :  { %p809_p7 = pnand %p808_p6, %p802_p3 }
  0x10   :  { %812 = shalt.err (!%p809_p7)
}
  0x11   :  { %s864_s19 = smov 64   ;;  %s865_s20 = smov 4  }
  0x12   :  { %21 = dma.hbm_to_vmem [thread:$0]  %s991_s0, 128, %s16_s10, [#allocation3], %s864_s19, %s864_s19, %s865_s20  }
  0x13   :  { %s866_s23 = smov [#allocation5]   ;;  %s813_s27 = scalar_lea.hbm %s992_s1, 4096 }
  0x14   :  { %s27_s24 = sshll.u32 %s866_s23, 4  ;;  %p814_p8 = scmp.ne.s32.totalorder %s992_s1, %s813_s27  ;;  %s28_s24 = int_to_ptr.vmem [resolvable:$true] %s27_s24 }
  0x15   :  { %p817_p9 = scmp.lt.u32.totalorder %s813_s27, %s992_s1 }
  0x17   :  { %p819_p10 = pnand %p817_p9, %p814_p8 }
  0x19   :  { %822 = shalt.err (!%p819_p10)
}
  0x1a   :  { %s823_s4 = scalar_lea.vmem %s28_s24, 4096  ;;  %p828_p12 = scmp.lt.s32.totalorder %s28_s24, %s28_s24 }
  0x1b   :  { %p824_p11 = scmp.ne.s32.totalorder %s28_s24, %s823_s4  ;;  %p829_p13 = scmp.lt.s32.totalorder %s823_s4, %s823_s4 }
  0x1d   :  { %p830_p0 = por %p829_p13, %p828_p12 }
  0x1f   :  { %p831_p1 = pnand %p830_p0, %p824_p11 }
  0x21   :  { %834 = shalt.err (!%p831_p1)
}
  0x22   :  { %33 = dma.hbm_to_vmem [thread:$0]  %s992_s1, 4096, %s28_s24, [#allocation6], %s864_s19, %s864_s19, %s865_s20  }
  0x23   :  { %857 = dma.done.wait [#allocation3], 128  }
  0x24   :  { %858 = vsyncadd [#allocation3], 4294967168 }
  0x25   :  { %859 = dma.done.wait [#allocation6], 4096  }
  0x26   :  { %860 = vsyncadd [#allocation6], 4294963200  ;;  %v867_v0 = vmov 0.0   ;;  %vm868_vm0 = vmmov 0   ;;  %v741_v1 = vld [vmem:[#allocation5] sm:$0xff]   ;;  %v742_v2 = vld [vmem:[#allocation5 + $0x8] sm:$0xff]  }
  0x27   :  { %652 = vmatprep.subr.bf16.mxu0 %v867_v0  ;;  %668 = vmatprep.mubr.msk.bf16.mxu0 %vm868_vm0, %v867_v0  ;;  %v743_v3 = vld [vmem:[#allocation5 + $0x10] sm:$0xff]   ;;  %v750_v4 = vld [vmem:[#allocation5 + $0x40] sm:$0xff]   ;;  %v744_v5 = vld [vmem:[#allocation5 + $0x18] sm:$0xff]   ;;  %s869_s1 = smov [#allocation7]  }
  0x28   :  { %672 = vmatprep.subr.bf16.mxu1 %v867_v0  ;;  %688 = vmatprep.mubr.msk.bf16.mxu1 %vm868_vm0, %v867_v0  ;;  %v751_v6 = vld [vmem:[#allocation5 + $0x48] sm:$0xff]   ;;  %v745_v7 = vld [vmem:[#allocation5 + $0x20] sm:$0xff]   ;;  %v752_v8 = vld [vmem:[#allocation5 + $0x50] sm:$0xff]   ;;  %s568_s6 = sshll.u32 %s869_s1, 4  ;;  %s569_s6 = int_to_ptr.vmem [resolvable:$true] %s568_s6 }
  0x29   :  { %653 = vmatpush3.bf16.msra.mxu0 %v741_v1  ;;  %673 = vmatpush3.bf16.msra.mxu1 %v750_v4  ;;  %v746_v9 = vld [vmem:[#allocation5 + $0x28] sm:$0xff]   ;;  %v753_v10 = vld [vmem:[#allocation5 + $0x58] sm:$0xff]   ;;  %v747_v11 = vld [vmem:[#allocation5 + $0x30] sm:$0xff]   ;;  %s835_s7 = scalar_lea.vmem %s569_s6, 256  ;;  %p840_p3 = scmp.lt.s32.totalorder %s569_s6, %s569_s6 }
  0x2a   :  { %654 = vmatprep.subr.bf16.mxu0 %v867_v0  ;;  %674 = vmatprep.subr.bf16.mxu1 %v867_v0  ;;  %v754_v12 = vld [vmem:[#allocation5 + $0x60] sm:$0xff]   ;;  %v748_v13 = vld [vmem:[#allocation5 + $0x38] sm:$0xff]   ;;  %v755_v15 = vld [vmem:[#allocation5 + $0x68] sm:$0xff]   ;;  %p836_p2 = scmp.ne.s32.totalorder %s569_s6, %s835_s7  ;;  %p841_p4 = scmp.lt.s32.totalorder %s835_s7, %s835_s7 }
  0x2b   :  { %v927_v14 = vld [vmem:[#allocation2] sm:$0xff]   ;;  %v756_v16 = vld [vmem:[#allocation5 + $0x70] sm:$0xff]   ;;  %v758_v18 = vld [vmem:[#allocation5 + $0x80] sm:$0xff]  }
  0x2c   :  { %v757_v17 = vld [vmem:[#allocation5 + $0x78] sm:$0xff]   ;;  %v760_v19 = vld [vmem:[#allocation5 + $0x88] sm:$0xff]   ;;  %v762_v20 = vld [vmem:[#allocation5 + $0x90] sm:$0xff]   ;;  %v43_v48 = vunpack.c.l.bf16 %v927_v14  ;;  %v44_v49 = vunpack.c.h.bf16 %v927_v14  ;;  %p842_p5 = por %p841_p4, %p840_p3 }
  0x2d   :  { %655 = vmatpush3.bf16.msra.mxu0 %v742_v2  ;;  %675 = vmatpush3.bf16.msra.mxu1 %v751_v6  ;;  %v764_v21 = vld [vmem:[#allocation5 + $0x98] sm:$0xff]   ;;  %v766_v22 = vld [vmem:[#allocation5 + $0xa0] sm:$0xff]   ;;  %v768_v23 = vld [vmem:[#allocation5 + $0xa8] sm:$0xff]  }
  0x2e   :  { %656 = vmatprep.subr.bf16.mxu0 %v867_v0  ;;  %676 = vmatprep.subr.bf16.mxu1 %v867_v0  ;;  %v759_v30 = vld [vmem:[#allocation5 + $0xc0] sm:$0xff]   ;;  %v761_v32 = vld [vmem:[#allocation5 + $0xc8] sm:$0xff]   ;;  %v763_v33 = vld [vmem:[#allocation5 + $0xd0] sm:$0xff]   ;;  %v521_v50 = vmul.f32 -0.5, %v43_v48  ;;  %v522_v51 = vmul.f32 -0.5, %v44_v49  ;;  %p843_p6 = pnand %p842_p5, %p836_p2 }
  0x2f   :  { %v765_v34 = vld [vmem:[#allocation5 + $0xd8] sm:$0xff]   ;;  %v767_v35 = vld [vmem:[#allocation5 + $0xe0] sm:$0xff]   ;;  %v769_v36 = vld [vmem:[#allocation5 + $0xe8] sm:$0xff]  }
  0x30   :  { %v770_v37 = vld [vmem:[#allocation5 + $0xb0] sm:$0xff]   ;;  %v772_v39 = vld [vmem:[#allocation5 + $0xb8] sm:$0xff]   ;;  %v958_v55 = vmul.f32 %v521_v50, %v43_v48  ;;  %v524_v62 = vmul.f32 %v522_v51, %v44_v49 }
  0x31   :  { %657 = vmatpush3.bf16.msra.mxu0 %v743_v3  ;;  %677 = vmatpush3.bf16.msra.mxu1 %v752_v8  ;;  %v771_v38 = vld [vmem:[#allocation5 + $0xf0] sm:$0xff]   ;;  %v773_v40 = vld [vmem:[#allocation5 + $0xf8] sm:$0xff]  }
  0x32   :  { %658 = vmatprep.subr.bf16.mxu0 %v867_v0  ;;  %678 = vmatprep.subr.bf16.mxu1 %v867_v0 }
  0x35   :  { %659 = vmatpush3.bf16.msra.mxu0 %v744_v5  ;;  %679 = vmatpush3.bf16.msra.mxu1 %v753_v10 }
  0x36   :  { %660 = vmatprep.subr.bf16.mxu0 %v867_v0  ;;  %680 = vmatprep.subr.bf16.mxu1 %v867_v0 }
  0x39   :  { %661 = vmatpush3.bf16.msra.mxu0 %v745_v7  ;;  %681 = vmatpush3.bf16.msra.mxu1 %v754_v12 }
  0x3a   :  { %662 = vmatprep.subr.bf16.mxu0 %v867_v0  ;;  %682 = vmatprep.subr.bf16.mxu1 %v867_v0 }
  0x3d   :  { %663 = vmatpush3.bf16.msra.mxu0 %v746_v9  ;;  %683 = vmatpush3.bf16.msra.mxu1 %v755_v15 }
  0x3e   :  { %664 = vmatprep.subr.bf16.mxu0 %v867_v0  ;;  %684 = vmatprep.subr.bf16.mxu1 %v867_v0 }
  0x41   :  { %665 = vmatpush3.bf16.msra.mxu0 %v747_v11  ;;  %685 = vmatpush3.bf16.msra.mxu1 %v756_v16 }
  0x42   :  { %666 = vmatprep.subr.bf16.mxu0 %v867_v0  ;;  %686 = vmatprep.subr.bf16.mxu1 %v867_v0 }
  0x45   :  { %667 = vmatpush3.bf16.msra.mxu0 %v748_v13  ;;  %687 = vmatpush3.bf16.msra.mxu1 %v757_v17 }
  0x46   :  { %692 = vmatprep.subr.bf16.mxu0 %v867_v0  ;;  %712 = vmatprep.subr.bf16.mxu1 %v867_v0 }
  0x48   :  { %669 = vmatmul.mubr.bf16.vlgmr.msra.gmra.mrb[0].mxu0 %v927_v14 }
  0x49   :  { %708 = vmatprep.mubr.msk.bf16.mxu0 %vm868_vm0, %v867_v0  ;;  %693 = vmatpush3.bf16.msra.mxu0 %v758_v18 }
  0x4a   :  { %694 = vmatprep.subr.bf16.mxu0 %v867_v0 }
  0x4d   :  { %695 = vmatpush3.bf16.msra.mxu0 %v760_v19 }
  0x4e   :  { %696 = vmatprep.subr.bf16.mxu0 %v867_v0 }
  0x51   :  { %697 = vmatpush3.bf16.msra.mxu0 %v762_v20 }
  0x52   :  { %698 = vmatprep.subr.bf16.mxu0 %v867_v0 }
  0x55   :  { %699 = vmatpush3.bf16.msra.mxu0 %v764_v21 }
  0x56   :  { %700 = vmatprep.subr.bf16.mxu0 %v867_v0 }
  0x59   :  { %701 = vmatpush3.bf16.msra.mxu0 %v766_v22 }
  0x5a   :  { %702 = vmatprep.subr.bf16.mxu0 %v867_v0 }
  0x5d   :  { %703 = vmatpush3.bf16.msra.mxu0 %v768_v23 }
  0x5e   :  { %704 = vmatprep.subr.bf16.mxu0 %v867_v0 }
  0x61   :  { %705 = vmatpush3.bf16.msra.mxu0 %v770_v37 }
  0x62   :  { %706 = vmatprep.subr.bf16.mxu0 %v867_v0 }
  0x65   :  { %707 = vmatpush3.bf16.msra.mxu0 %v772_v39 }
 0x11b   :  { %v197_v24 = vpop.f32.mrb[0].mxu0 }
 0x11c   :  { %v670_v25 = vpop.f32.mrb[1].mxu0  ;;  %v204_v27 = vmax.f32 %v197_v24, 0.0 }
 0x11d   :  { %v200_v26 = vpop.f32.mrb[2].mxu0 }
 0x11e   :  { %v205_v28 = vmax.f32 %v200_v26, 0.0  ;;  %v671_v29 = vpop.f32.mrb[3].mxu0 }
 0x120   :  { %v206_v31 = vpack.c.bf16 %v205_v28, %v204_v27 }
 0x122   :  { %689 = vmatmul.mubr.bf16.vlgmr.msra.gmra.mrb[0].mxu1 %v206_v31 }
 0x123   :  { %713 = vmatpush3.bf16.msra.mxu1 %v759_v30  ;;  %728 = vmatprep.mubr.msk.bf16.mxu1 %vm868_vm0, %v867_v0 }
 0x124   :  { %714 = vmatprep.subr.bf16.mxu1 %v867_v0 }
 0x127   :  { %715 = vmatpush3.bf16.msra.mxu1 %v761_v32 }
 0x128   :  { %716 = vmatprep.subr.bf16.mxu1 %v867_v0 }
 0x12b   :  { %717 = vmatpush3.bf16.msra.mxu1 %v763_v33  ;;  %v537_v33 = vlaneseq }
 0x12c   :  { %718 = vmatprep.subr.bf16.mxu1 %v867_v0 }
 0x12f   :  { %719 = vmatpush3.bf16.msra.mxu1 %v765_v34 }
 0x130   :  { %720 = vmatprep.subr.bf16.mxu1 %v867_v0 }
 0x133   :  { %721 = vmatpush3.bf16.msra.mxu1 %v767_v35 }
 0x134   :  { %722 = vmatprep.subr.bf16.mxu1 %v867_v0 }
 0x137   :  { %723 = vmatpush3.bf16.msra.mxu1 %v769_v36 }
 0x138   :  { %724 = vmatprep.subr.bf16.mxu1 %v867_v0 }
 0x13b   :  { %725 = vmatpush3.bf16.msra.mxu1 %v771_v38 }
 0x13c   :  { %726 = vmatprep.subr.bf16.mxu1 %v867_v0 }
 0x13f   :  { %727 = vmatpush3.bf16.msra.mxu1 %v773_v40 }
 0x1f5   :  { %v289_v41 = vpop.f32.mrb[0].mxu1 }
 0x1f6   :  { %v690_v42 = vpop.f32.mrb[1].mxu1  ;;  %v296_v44 = vmax.f32 %v289_v41, 0.0 }
 0x1f7   :  { %v292_v43 = vpop.f32.mrb[2].mxu1  ;;  %v538_v42 = vand.u32 127, %v537_v33 }
 0x1f8   :  { %v297_v45 = vmax.f32 %v292_v43, 0.0  ;;  %v691_v46 = vpop.f32.mrb[3].mxu1 }
 0x1f9   :  { %vm539_vm3 = vcmp.lt.s32.totalorder %v538_v42, 4  ;;  %vm552_vm4 = vcmp.eq.s32.totalorder %v538_v42, 12  ;;  %vm551_vm5 = vcmp.lt.s32.totalorder %v538_v42, 12  ;;  %vm550_vm6 = vcmp.lt.s32.totalorder %v538_v42, 8 }
 0x1fa   :  { %v298_v47 = vpack.c.bf16 %v297_v45, %v296_v44 }
 0x1fc   :  { %709 = vmatmul.mubr.bf16.vlgmr.msra.gmra.mrb[4].mxu0 %v298_v47  ;;  %729 = vmatmul.mubr.bf16.vlgmr.msra.gmra.mrb[4].mxu1 %v298_v47 }
 0x2cf   :  { %v956_v52 = vpop.f32.mrb[4].mxu0  ;;  %v470_v53 = vpop.f32.mrb[4].mxu1 }
 0x2d0   :  { %v477_v54 = vmax.f32 %v470_v53, -20.0  ;;  %v710_v56 = vpop.f32.mrb[5].mxu0  ;;  %v730_v57 = vpop.f32.mrb[5].mxu1 }
 0x2d1   :  { %v960_v58 = vpop.f32.mrb[6].mxu0  ;;  %v473_v59 = vpop.f32.mrb[6].mxu1 }
 0x2d2   :  { %v479_v60 = vmin.f32 %v477_v54, 2.0  ;;  %v478_v61 = vmax.f32 %v473_v59, -20.0  ;;  %v711_v63 = vpop.f32.mrb[7].mxu0  ;;  %v731_v0 = vpop.f32.mrb[7].mxu1 }
 0x2d4   :  { %v481_v1 = vmul.f32 1.442695, %v479_v60  ;;  %v525_v2 = vsub.f32 %v958_v55, %v479_v60  ;;  %v480_v3 = vmin.f32 %v478_v61, 2.0 }
 0x2d6   :  { %775 = vpow2.f32 %v481_v1  ;;  %v483_v4 = vmul.f32 1.442695, %v480_v3  ;;  %v526_v5 = vsub.f32 %v524_v62, %v480_v3  ;;  %v614_v47 = vadd.f32 -0.9189385, %v525_v2 }
 0x2d8   :  { %777 = vpow2.f32 %v483_v4  ;;  %v615_v50 = vadd.f32 -0.9189385, %v526_v5 }
 0x2e0   :  { %v963_v6 = vpop.eup %775 }
 0x2e1   :  { %v485_v7 = vmul.f32 %v963_v6, %v43_v48 }
 0x2e2   :  { %v966_v8 = vpop.eup %777 }
 0x2e3   :  { %v487_v9 = vadd.f32 %v485_v7, %v956_v52  ;;  %v486_v10 = vmul.f32 %v966_v8, %v44_v49 }
 0x2e5   :  { %v489_v11 = vmul.f32 -2.0, %v487_v9  ;;  %v488_v12 = vadd.f32 %v486_v10, %v960_v58  ;;  %v529_v40 = vsub.f32 0.6931472, %v487_v9 }
 0x2e7   :  { %v493_v13 = vand.u32 2147483647, %v489_v11  ;;  %v490_v14 = vmul.f32 -2.0, %v488_v12  ;;  %v491_v35 = vmax.f32 %v489_v11, 0.0  ;;  %v530_v46 = vsub.f32 0.6931472, %v488_v12 }
 0x2e9   :  { %v495_v15 = vsub.f32 0.0, %v493_v13  ;;  %v494_v16 = vand.u32 2147483647, %v490_v14  ;;  %v492_v41 = vmax.f32 %v490_v14, 0.0 }
 0x2eb   :  { %v497_v17 = vmul.f32 1.442695, %v495_v15  ;;  %v496_v18 = vsub.f32 0.0, %v494_v16 }
 0x2ed   :  { %779 = vpow2.f32 %v497_v17  ;;  %v499_v19 = vmul.f32 1.442695, %v496_v18 }
 0x2ef   :  { %781 = vpow2.f32 %v499_v19 }
 0x2f7   :  { %v780_v20 = vpop.eup %779 }
 0x2f8   :  { %v501_v21 = vadd.f32 1.0, %v780_v20  ;;  %v504_v24 = vmul.f32 -0.5, %v780_v20  ;;  %v507_v27 = vand.u32 2147483647, %v780_v20 }
 0x2f9   :  { %v782_v22 = vpop.eup %781 }
 0x2fa   :  { %783 = vlog2.f32 %v501_v21  ;;  %v510_v23 = vadd.f32 1.0, %v782_v22  ;;  %v513_v25 = vmul.f32 -0.5, %v782_v22  ;;  %v505_v26 = vadd.f32 1.0, %v504_v24 }
 0x2fb   :  { %v516_v30 = vand.u32 2147483647, %v782_v22  ;;  %vm508_vm1 = vcmp.lt.f32.partialorder %v507_v27, 0.0004427343 }
 0x2fc   :  { %785 = vlog2.f32 %v510_v23  ;;  %v514_v28 = vadd.f32 1.0, %v513_v25  ;;  %v506_v32 = vmul.f32 %v780_v20, %v505_v26 }
 0x2fd   :  { %vm517_vm2 = vcmp.lt.f32.partialorder %v516_v30, 0.0004427343  ;;  %787 = vtanh.f32 %v487_v9 }
 0x2fe   :  { %v515_v38 = vmul.f32 %v782_v22, %v514_v28  ;;  %789 = vtanh.f32 %v488_v12 }
 0x304   :  { %v784_v29 = vpop.eup %783 }
 0x305   :  { %v503_v31 = vmul.f32 0.6931472, %v784_v29 }
 0x306   :  { %v786_v34 = vpop.eup %785 }
 0x307   :  { %v509_v36 = vsel %vm508_vm1, %v506_v32, %v503_v31  ;;  %v512_v37 = vmul.f32 0.6931472, %v786_v34  ;;  %v788_v57 = vpop.eup %787 }
 0x308   :  { %v519_v39 = vadd.f32 %v509_v36, %v491_v35  ;;  %v548_v61 = vmul.f32 2.0, %v788_v57  ;;  %v790_v63 = vpop.eup %789 }
 0x309   :  { %v518_v43 = vsel %vm517_vm2, %v515_v38, %v512_v37  ;;  %v549_v4 = vmul.f32 2.0, %v790_v63 }
 0x30a   :  { %v531_v44 = vsub.f32 %v529_v40, %v519_v39  ;;  %v520_v45 = vadd.f32 %v518_v43, %v492_v41 }
 0x30c   :  { %v533_v48 = vmul.f32 2.0, %v531_v44  ;;  %v532_v49 = vsub.f32 %v530_v46, %v520_v45 }
 0x30e   :  { %v535_v51 = vsub.f32 %v614_v47, %v533_v48  ;;  %v534_v53 = vmul.f32 2.0, %v532_v49 }
 0x310   :  { %v540_v54 = vsel %vm539_vm3, %v535_v51, 0.0  ;;  %v536_v55 = vsub.f32 %v615_v50, %v534_v53 }
 0x311   :  { %542 = vadd.xlane.f32.xlu0 %v540_v54 }
 0x312   :  { %v541_v56 = vsel %vm539_vm3, %v536_v55, 0.0 }
 0x315   :  { %544 = vadd.xlane.f32.xlu0 %v541_v56 }
 0x39e   :  { %v543_v59 = vpop.xlane.xlu0 %542 }
 0x39f   :  { %v553_v60 = vsel %vm552_vm4, %v543_v59, 0.0 }
 0x3a0   :  { %v555_v62 = vsel %vm551_vm5, %v963_v6, %v553_v60 }
 0x3a1   :  { %v557_v0 = vsel %vm550_vm6, %v956_v52, %v555_v62 }
 0x3a2   :  { %v559_v1 = vsel %vm539_vm3, %v548_v61, %v557_v0  ;;  %v545_v2 = vpop.xlane.xlu0 %544 }
 0x3a3   :  { %561 = vst [vmem:[#allocation7] sm:$0xff] %v559_v1  ;;  %v554_v3 = vsel %vm552_vm4, %v545_v2, 0.0 }
 0x3a4   :  { %v556_v5 = vsel %vm551_vm5, %v966_v8, %v554_v3 }
 0x3a5   :  { %v558_v7 = vsel %vm550_vm6, %v960_v58, %v556_v5 }
 0x3a6   :  { %v560_v9 = vsel %vm539_vm3, %v549_v4, %v558_v7 }
 0x3a7   :  { %562 = vst [vmem:[#allocation7 + $0x8] sm:$0xff] %v560_v9 }
 0x3a8   :  { %846 = shalt.err (!%p843_p6)
}
 0x3a9   :  { %s847_s10 = scalar_lea.hbm %s993_s2, 256 }
 0x3aa   :  { %p848_p7 = scmp.ne.s32.totalorder %s993_s2, %s847_s10  ;;  %p851_p8 = scmp.lt.u32.totalorder %s847_s10, %s993_s2 }
 0x3ac   :  { %p853_p9 = pnand %p851_p8, %p848_p7 }
 0x3ae   :  { %856 = shalt.err (!%p853_p9)
}
 0x3af   :  { %s870_s15 = smov 128   ;;  %s871_s16 = smov 8  }
 0x3b0   :  { %574 = dma.vmem_to_hbm [thread:$0]  %s569_s6, 256, %s993_s2, [#allocation4], %s870_s15, %s870_s15, %s871_s16  }
 0x3b1   :  { %861 = dma.done.wait [#allocation4], 256  }
 0x3b2   :  { %862 = vsyncadd [#allocation4], 4294967040 }
 0x3b3   :  { %578 = vsyncpa [#allocation3], 1 }
 0x3b4   :  { %579 = vsyncpa [#allocation6], 1 }
 0x3b5   :  { %580 = vsyncpa [#allocation4], 1 }

</bundles_post_ra>
